<compile_context>
chip_gen: v7x
topology: tpu7x:2x2x1
jax: 0.10.0
libtpu: 0.0.40
codegen_flags: <defaults>
</compile_context>

<pallas_src>
from functools import partial

import jax
import jax.numpy as jnp
from jax import lax
from jax.experimental import pallas as pl
from jax.experimental.pallas import tpu as pltpu


def mha_kernel(x_ref, wqkv_ref, wo_ref, o_ref, qkv_sc, ho_sc, *,
               num_heads, head_dim, q_tile):
    """One (batch row, query tile) grid step.

    x_ref:    (1, S, E)   bf16  full sequence of one batch row
    wqkv_ref: (E, 3E)     bf16  [wq * 1/sqrt(D) | wk | wv]
    wo_ref:   (E, E)      bf16
    o_ref:    (1, Tq, E)  out dtype
    qkv_sc:   (S, 3E)     bf16  VMEM scratch: fused QKV projection cache
    ho_sc:    (Tq, E)     f32   VMEM scratch: merged per-head attention outputs
    """
    qi = pl.program_id(1)
    E = num_heads * head_dim

    # Fused QKV projection for the whole sequence, once per batch row.
    # Correctness invariant: the query-tile axis must remain the innermost,
    # sequential ("arbitrary") grid axis so (b, 0) runs before (b, qi > 0) on the
    # same core and the scratch persists across those steps. Do NOT mark it
    # "parallel" or reorder the grid.
    @pl.when(qi == 0)
    def _():
        x = x_ref[0]                                                   # (S, E) bf16
        qkv = jnp.dot(x, wqkv_ref[...], preferred_element_type=jnp.float32)
        qkv_sc[...] = qkv.astype(jnp.bfloat16)

    q_start = pl.multiple_of(qi * q_tile, q_tile)

    # TODO(synk): for large num_heads, replace the fully unrolled Python loop with
    #             lax.fori_loop(..., unroll=True) over head chunks to bound live
    #             ranges; H is tiny and static here.
    for h in range(num_heads):                                         # static unroll
        lo = h * head_dim
        # Head-h columns of Q (query tile only) and of K/V (full sequence).
        q_h = qkv_sc[pl.ds(q_start, q_tile), lo:lo + head_dim]         # (Tq, D) bf16, pre-scaled
        k_h = qkv_sc[:, E + lo:E + lo + head_dim]                      # (S,  D) bf16
        v_h = qkv_sc[:, 2 * E + lo:2 * E + lo + head_dim]              # (S,  D) bf16

        # scores = q_h @ k_h^T (contraction over D), f32 accumulation on the MXU.
        s = lax.dot_general(q_h, k_h, (((1,), (1,)), ((), ())),
                            preferred_element_type=jnp.float32)        # (Tq, S) f32

        # f32 softmax; normalization deferred past the P@V matmul so the divide
        # acts on the (Tq, D) head output, not the (Tq, S) probabilities.
        m = jnp.max(s, axis=-1, keepdims=True)
        e = jnp.exp(s - m)
        l = jnp.sum(e, axis=-1, keepdims=True)                         # (Tq, 1) f32
        u = jnp.dot(e.astype(jnp.bfloat16), v_h,
                    preferred_element_type=jnp.float32)                # (Tq, D) f32

        # Head-merge by column slice into the shared (Tq, E) scratch (exact divide;
        # the approx reciprocal was dropped for accuracy).
        ho_sc[:, lo:lo + head_dim] = u / l

    # Single output projection with a full E-deep contraction (fills the MXU),
    # replacing H small D-deep matmuls.
    out = jnp.dot(ho_sc[...].astype(jnp.bfloat16), wo_ref[...],
                  preferred_element_type=jnp.float32)                  # (Tq, E) f32
    o_ref[0] = out.astype(o_ref.dtype)


def multi_head_attention_v2(x, wq, wk, wv, wout, *, num_heads,
                            max_q_tile=256, out_dtype=jnp.float32):
    B, S, E = x.shape
    head_dim = E // num_heads
    assert head_dim * num_heads == E, "embed_dim should be divisible by n_heads"

    # Fold the 1/sqrt(D) scale into wq, fuse the three projections, cast MXU
    # operands to bf16 (accumulation stays f32 inside the kernel).
    scale = 1.0 / (head_dim ** 0.5)
    wqkv = jnp.concatenate([wq * scale, wk, wv], axis=1).astype(jnp.bfloat16)   # (E, 3E)
    wo_b = wout.astype(jnp.bfloat16)
    x_b = x.astype(jnp.bfloat16)

    # Query-tile size: whole sequence if small, otherwise a multiple-of-8 tile.
    # (Raise max_q_tile to 512 on v5e/v6e's 128 MiB VMEM; keep <=256 on v7x.)
    q_tile = S if S <= max_q_tile else max_q_tile
    assert S % q_tile == 0, "seq_len must be divisible by the query tile"
    nq = S // q_tile

    kernel = partial(mha_kernel, num_heads=num_heads, head_dim=head_dim, q_tile=q_tile)

    return pl.pallas_call(
        kernel,
        out_shape=jax.ShapeDtypeStruct((B, S, E), out_dtype),
        grid_spec=pltpu.PrefetchScalarGridSpec(
            num_scalar_prefetch=0,
            grid=(B, nq),
            in_specs=[
                # Full sequence for one batch row; block index constant across the
                # query-tile axis -> only re-DMA'd when b changes.
                pl.BlockSpec((1, S, E), lambda b, q: (b, 0, 0)),
                # Weights: whole blocks, constant index -> DMA'd once.
                pl.BlockSpec((E, 3 * E), lambda b, q: (0, 0)),
                pl.BlockSpec((E, E), lambda b, q: (0, 0)),
            ],
            out_specs=pl.BlockSpec((1, q_tile, E), lambda b, q: (b, q, 0)),
            scratch_shapes=[
                pltpu.VMEM((S, 3 * E), jnp.bfloat16),   # fused QKV cache (per batch row)
                pltpu.VMEM((q_tile, E), jnp.float32),   # merged head outputs
            ],
        ),
        compiler_params=pltpu.CompilerParams(
            dimension_semantics=("parallel", "arbitrary"),
            # Demo footprint is tiny; re-derive for large E/S, keeping v7x's
            # 64 MiB physical VMEM in mind.
            vmem_limit_bytes=32 * 1024 * 1024,
        ),
    )(x_b, wqkv, wo_b)


# ---------------------------------------------------------------------------
# Pure-JAX references for verification.
# ---------------------------------------------------------------------------

def reference_mha_f32(x, wq, wk, wv, wout, *, num_heads):
    """Exact f32 re-implementation of the PyTorch forward."""
    B, S, E = x.shape
    D = E // num_heads
    q = x @ wq
    k = x @ wk
    v = x @ wv
    q = q.reshape(B, S, num_heads, D).transpose(0, 2, 1, 3)
    k = k.reshape(B, S, num_heads, D).transpose(0, 2, 1, 3)
    v = v.reshape(B, S, num_heads, D).transpose(0, 2, 1, 3)
    scores = jnp.einsum("bhqd,bhkd->bhqk", q, k) / (D ** 0.5)
    attn = jax.nn.softmax(scores, axis=-1)
    out = jnp.einsum("bhqk,bhkd->bhqd", attn, v)
    out = out.transpose(0, 2, 1, 3).reshape(B, S, E)
    return out @ wout


def reference_mha_bf16(x, wq, wk, wv, wout, *, num_heads):
    """Same math with the kernel's bf16-at-MXU-operands numerics (f32 softmax)."""
    B, S, E = x.shape
    D = E // num_heads
    scale = 1.0 / (D ** 0.5)
    xb = x.astype(jnp.bfloat16)
    wqkv = jnp.concatenate([wq * scale, wk, wv], axis=1).astype(jnp.bfloat16)
    qkv = jnp.einsum("bse,ef->bsf", xb, wqkv,
                     preferred_element_type=jnp.float32).astype(jnp.bfloat16)
    q, k, v = qkv[..., :E], qkv[..., E:2 * E], qkv[..., 2 * E:]
    q = q.reshape(B, S, num_heads, D).transpose(0, 2, 1, 3)
    k = k.reshape(B, S, num_heads, D).transpose(0, 2, 1, 3)
    v = v.reshape(B, S, num_heads, D).transpose(0, 2, 1, 3)
    s = jnp.einsum("bhqd,bhkd->bhqk", q, k, preferred_element_type=jnp.float32)
    m = jnp.max(s, axis=-1, keepdims=True)
    e = jnp.exp(s - m)
    l = jnp.sum(e, axis=-1, keepdims=True)
    u = jnp.einsum("bhqk,bhkd->bhqd", e.astype(jnp.bfloat16), v,
                   preferred_element_type=jnp.float32)
    o = (u / l).transpose(0, 2, 1, 3).reshape(B, S, E)
    return jnp.einsum("bse,ef->bsf", o.astype(jnp.bfloat16),
                      wout.astype(jnp.bfloat16), preferred_element_type=jnp.float32)


def max_scaled_err(a, b):
    """Max abs error scaled by the reference's max magnitude (robust near zero)."""
    a = jnp.asarray(a, jnp.float32)
    b = jnp.asarray(b, jnp.float32)
    return float(jnp.max(jnp.abs(a - b)) / jnp.maximum(jnp.max(jnp.abs(b)), 1e-6))


if __name__ == "__main__":
    # Small shapes consistent with the module's forward.
    B, S, E, H = 2, 8, 32, 4

    key = jax.random.PRNGKey(0)
    kx, kq, kk, kv, ko = jax.random.split(key, 5)

    # Parameters: torch.randn-style standard normal (as in the module's __init__).
    # Input x is scaled down so the randn-scale weights do not drive the softmax
    # into a near-argmax regime, keeping the bf16-vs-f32 comparison well conditioned.
    x = 0.25 * jax.random.normal(kx, (B, S, E), dtype=jnp.float32)
    wq = jax.random.normal(kq, (E, E), dtype=jnp.float32)
    wk = jax.random.normal(kk, (E, E), dtype=jnp.float32)
    wv = jax.random.normal(kv, (E, E), dtype=jnp.float32)
    wout = jax.random.normal(ko, (E, E), dtype=jnp.float32)

    out = multi_head_attention_v2(x, wq, wk, wv, wout, num_heads=H)
    out = jax.block_until_ready(out)
    assert out.shape == (B, S, E)
    assert out.dtype == jnp.float32

    # Structural check against a reference with matched bf16 numerics.
    ref_match = reference_mha_bf16(x, wq, wk, wv, wout, num_heads=H)
    err_match = max_scaled_err(out, ref_match)
    assert err_match < 2e-2, f"mismatch vs bf16-matched reference: {err_match}"

    # Sanity check against the exact-f32 PyTorch-equivalent math (loose: bf16 MXU
    # operands round Q/K/V/probabilities).
    ref_f32 = reference_mha_f32(x, wq, wk, wv, wout, num_heads=H)
    err_f32 = max_scaled_err(out, ref_f32)
    assert err_f32 < 1e-1, f"mismatch vs f32 reference: {err_f32}"

    print("KERNEL_OK")
</pallas_src>

<mosaic_0001>
module attributes {stable_mosaic.version = 11 : i64} {
  func.func @mha_kernel(%arg0: i32, %arg1: i32, %arg2: memref<1x8x32xbf16, #tpu.memory_space<vmem>>, %arg3: memref<32x96xbf16, #tpu.memory_space<vmem>>, %arg4: memref<32x32xbf16, #tpu.memory_space<vmem>>, %arg5: memref<1x8x32xf32, #tpu.memory_space<vmem>>, %arg6: memref<8x96xbf16, #tpu.memory_space<vmem>>, %arg7: memref<8x32xf32, #tpu.memory_space<vmem>>) attributes {dimension_semantics = [#tpu.dimension_semantics<parallel>, #tpu.dimension_semantics<arbitrary>], iteration_bounds = array<i64: 2, 1>, scalar_prefetch = 0 : i64, scratch_operands = 2 : i64, tpu.core_type = #tpu.core_type<tc>, window_params = [{transform_indices = @transform_0, window_bounds = array<i64: 1, 8, 32>}, {pipeline_mode = #tpu.pipeline_mode<synchronous>, transform_indices = @transform_1, window_bounds = array<i64: 32, 96>}, {pipeline_mode = #tpu.pipeline_mode<synchronous>, transform_indices = @transform_2, window_bounds = array<i64: 32, 32>}, {transform_indices = @transform_3, window_bounds = array<i64: 1, 8, 32>}]} {
    %c0_i32 = arith.constant 0 : i32
    %0 = arith.cmpi eq, %arg1, %c0_i32 : i32
    %1 = arith.extui %0 : i1 to i32
    %c0_i32_0 = arith.constant 0 : i32
    %2 = arith.cmpi ne, %1, %c0_i32_0 : i32
    scf.if %2 {
      %c0_40 = arith.constant 0 : index
      %c0_41 = arith.constant 0 : index
      %c0_42 = arith.constant 0 : index
      %80 = vector.load %arg2[%c0_40, %c0_41, %c0_42] : memref<1x8x32xbf16, #tpu.memory_space<vmem>>, vector<1x8x32xbf16>
      %81 = vector.shape_cast %80 : vector<1x8x32xbf16> to vector<8x32xbf16>
      %c0_43 = arith.constant 0 : index
      %c0_44 = arith.constant 0 : index
      %82 = vector.load %arg3[%c0_43, %c0_44] : memref<32x96xbf16, #tpu.memory_space<vmem>>, vector<32x96xbf16>
      %cst_45 = arith.constant dense<0.000000e+00> : vector<8x96xf32>
      %83 = tpu.matmul %81, %82, %cst_45 {dimension_numbers = #tpu.dot_dimension_numbers<[1], [0], [0], [1], [0, 0, 1, 1], [], []>} : vector<8x32xbf16>, vector<32x96xbf16>, vector<8x96xf32> -> vector<8x96xf32>
      %84 = arith.truncf %83 : vector<8x96xf32> to vector<8x96xbf16>
      %c0_46 = arith.constant 0 : index
      %c0_47 = arith.constant 0 : index
      %85 = vector.load %arg6[%c0_46, %c0_47] : memref<8x96xbf16, #tpu.memory_space<vmem>>, vector<8x96xbf16>
      tpu.vector_store %arg6[%c0_46, %c0_47], %84 {strides = array<i32>} : memref<8x96xbf16, #tpu.memory_space<vmem>>, vector<8x96xbf16>,
    } else {
    }
    %c8_i32 = arith.constant 8 : i32
    %3 = arith.muli %arg1, %c8_i32 : i32
    %4 = tpu.assume_multiple %3, 8 : i32
    %5 = arith.index_cast %4 : i32 to index
    %c0 = arith.constant 0 : index
    %6 = vector.load %arg6[%5, %c0] : memref<8x96xbf16, #tpu.memory_space<vmem>>, vector<8x8xbf16>
    %c0_1 = arith.constant 0 : index
    %c32 = arith.constant 32 : index
    %7 = vector.load %arg6[%c0_1, %c32] : memref<8x96xbf16, #tpu.memory_space<vmem>>, vector<8x8xbf16>
    %c0_2 = arith.constant 0 : index
    %c64 = arith.constant 64 : index
    %8 = vector.load %arg6[%c0_2, %c64] : memref<8x96xbf16, #tpu.memory_space<vmem>>, vector<8x8xbf16>
    %cst = arith.constant dense<0.000000e+00> : vector<8x8xf32>
    %9 = tpu.matmul %6, %7, %cst {dimension_numbers = #tpu.dot_dimension_numbers<[1], [1], [0], [0], [0, 0, 1, 0], [], []>} : vector<8x8xbf16>, vector<8x8xbf16>, vector<8x8xf32> -> vector<8x8xf32>
    %cst_3 = arith.constant dense<0xFF800000> : vector<8xf32>
    %10 = vector.multi_reduction <maximumf>, %9, %cst_3 [1] : vector<8x8xf32> to vector<8xf32>
    %11 = vector.shape_cast %10 : vector<8xf32> to vector<8x1xf32>
    %12 = vector.broadcast %11 : vector<8x1xf32> to vector<8x8xf32>
    %13 = arith.subf %9, %12 : vector<8x8xf32>
    %14 = math.exp %13 : vector<8x8xf32>
    %cst_4 = arith.constant dense<0.000000e+00> : vector<8xf32>
    %15 = vector.multi_reduction <add>, %14, %cst_4 [1] : vector<8x8xf32> to vector<8xf32>
    %16 = vector.shape_cast %15 : vector<8xf32> to vector<8x1xf32>
    %17 = arith.truncf %14 : vector<8x8xf32> to vector<8x8xbf16>
    %cst_5 = arith.constant dense<0.000000e+00> : vector<8x8xf32>
    %18 = tpu.matmul %17, %8, %cst_5 {dimension_numbers = #tpu.dot_dimension_numbers<[1], [0], [0], [1], [0, 0, 1, 1], [], []>} : vector<8x8xbf16>, vector<8x8xbf16>, vector<8x8xf32> -> vector<8x8xf32>
    %19 = vector.broadcast %16 : vector<8x1xf32> to vector<8x8xf32>
    %20 = arith.divf %18, %19 : vector<8x8xf32>
    %c0_6 = arith.constant 0 : index
    %c0_7 = arith.constant 0 : index
    %21 = vector.load %arg7[%c0_6, %c0_7] : memref<8x32xf32, #tpu.memory_space<vmem>>, vector<8x8xf32>
    tpu.vector_store %arg7[%c0_6, %c0_7], %20 {strides = array<i32>} : memref<8x32xf32, #tpu.memory_space<vmem>>, vector<8x8xf32>,
    %22 = arith.index_cast %4 : i32 to index
    %c8 = arith.constant 8 : index
    %23 = vector.load %arg6[%22, %c8] : memref<8x96xbf16, #tpu.memory_space<vmem>>, vector<8x8xbf16>
    %c0_8 = arith.constant 0 : index
    %c40 = arith.constant 40 : index
    %24 = vector.load %arg6[%c0_8, %c40] : memref<8x96xbf16, #tpu.memory_space<vmem>>, vector<8x8xbf16>
    %c0_9 = arith.constant 0 : index
    %c72 = arith.constant 72 : index
    %25 = vector.load %arg6[%c0_9, %c72] : memref<8x96xbf16, #tpu.memory_space<vmem>>, vector<8x8xbf16>
    %cst_10 = arith.constant dense<0.000000e+00> : vector<8x8xf32>
    %26 = tpu.matmul %23, %24, %cst_10 {dimension_numbers = #tpu.dot_dimension_numbers<[1], [1], [0], [0], [0, 0, 1, 0], [], []>} : vector<8x8xbf16>, vector<8x8xbf16>, vector<8x8xf32> -> vector<8x8xf32>
    %cst_11 = arith.constant dense<0xFF800000> : vector<8xf32>
    %27 = vector.multi_reduction <maximumf>, %26, %cst_11 [1] : vector<8x8xf32> to vector<8xf32>
    %28 = vector.shape_cast %27 : vector<8xf32> to vector<8x1xf32>
    %29 = vector.broadcast %28 : vector<8x1xf32> to vector<8x8xf32>
    %30 = arith.subf %26, %29 : vector<8x8xf32>
    %31 = math.exp %30 : vector<8x8xf32>
    %cst_12 = arith.constant dense<0.000000e+00> : vector<8xf32>
    %32 = vector.multi_reduction <add>, %31, %cst_12 [1] : vector<8x8xf32> to vector<8xf32>
    %33 = vector.shape_cast %32 : vector<8xf32> to vector<8x1xf32>
    %34 = arith.truncf %31 : vector<8x8xf32> to vector<8x8xbf16>
    %cst_13 = arith.constant dense<0.000000e+00> : vector<8x8xf32>
    %35 = tpu.matmul %34, %25, %cst_13 {dimension_numbers = #tpu.dot_dimension_numbers<[1], [0], [0], [1], [0, 0, 1, 1], [], []>} : vector<8x8xbf16>, vector<8x8xbf16>, vector<8x8xf32> -> vector<8x8xf32>
    %36 = vector.broadcast %33 : vector<8x1xf32> to vector<8x8xf32>
    %37 = arith.divf %35, %36 : vector<8x8xf32>
    %c0_14 = arith.constant 0 : index
    %c8_15 = arith.constant 8 : index
    %38 = vector.load %arg7[%c0_14, %c8_15] : memref<8x32xf32, #tpu.memory_space<vmem>>, vector<8x8xf32>
    tpu.vector_store %arg7[%c0_14, %c8_15], %37 {strides = array<i32>} : memref<8x32xf32, #tpu.memory_space<vmem>>, vector<8x8xf32>,
    %39 = arith.index_cast %4 : i32 to index
    %c16 = arith.constant 16 : index
    %40 = vector.load %arg6[%39, %c16] : memref<8x96xbf16, #tpu.memory_space<vmem>>, vector<8x8xbf16>
    %c0_16 = arith.constant 0 : index
    %c48 = arith.constant 48 : index
    %41 = vector.load %arg6[%c0_16, %c48] : memref<8x96xbf16, #tpu.memory_space<vmem>>, vector<8x8xbf16>
    %c0_17 = arith.constant 0 : index
    %c80 = arith.constant 80 : index
    %42 = vector.load %arg6[%c0_17, %c80] : memref<8x96xbf16, #tpu.memory_space<vmem>>, vector<8x8xbf16>
    %cst_18 = arith.constant dense<0.000000e+00> : vector<8x8xf32>
    %43 = tpu.matmul %40, %41, %cst_18 {dimension_numbers = #tpu.dot_dimension_numbers<[1], [1], [0], [0], [0, 0, 1, 0], [], []>} : vector<8x8xbf16>, vector<8x8xbf16>, vector<8x8xf32> -> vector<8x8xf32>
    %cst_19 = arith.constant dense<0xFF800000> : vector<8xf32>
    %44 = vector.multi_reduction <maximumf>, %43, %cst_19 [1] : vector<8x8xf32> to vector<8xf32>
    %45 = vector.shape_cast %44 : vector<8xf32> to vector<8x1xf32>
    %46 = vector.broadcast %45 : vector<8x1xf32> to vector<8x8xf32>
    %47 = arith.subf %43, %46 : vector<8x8xf32>
    %48 = math.exp %47 : vector<8x8xf32>
    %cst_20 = arith.constant dense<0.000000e+00> : vector<8xf32>
    %49 = vector.multi_reduction <add>, %48, %cst_20 [1] : vector<8x8xf32> to vector<8xf32>
    %50 = vector.shape_cast %49 : vector<8xf32> to vector<8x1xf32>
    %51 = arith.truncf %48 : vector<8x8xf32> to vector<8x8xbf16>
    %cst_21 = arith.constant dense<0.000000e+00> : vector<8x8xf32>
    %52 = tpu.matmul %51, %42, %cst_21 {dimension_numbers = #tpu.dot_dimension_numbers<[1], [0], [0], [1], [0, 0, 1, 1], [], []>} : vector<8x8xbf16>, vector<8x8xbf16>, vector<8x8xf32> -> vector<8x8xf32>
    %53 = vector.broadcast %50 : vector<8x1xf32> to vector<8x8xf32>
    %54 = arith.divf %52, %53 : vector<8x8xf32>
    %c0_22 = arith.constant 0 : index
    %c16_23 = arith.constant 16 : index
    %55 = vector.load %arg7[%c0_22, %c16_23] : memref<8x32xf32, #tpu.memory_space<vmem>>, vector<8x8xf32>
    tpu.vector_store %arg7[%c0_22, %c16_23], %54 {strides = array<i32>} : memref<8x32xf32, #tpu.memory_space<vmem>>, vector<8x8xf32>,
    %56 = arith.index_cast %4 : i32 to index
    %c24 = arith.constant 24 : index
    %57 = vector.load %arg6[%56, %c24] : memref<8x96xbf16, #tpu.memory_space<vmem>>, vector<8x8xbf16>
    %c0_24 = arith.constant 0 : index
    %c56 = arith.constant 56 : index
    %58 = vector.load %arg6[%c0_24, %c56] : memref<8x96xbf16, #tpu.memory_space<vmem>>, vector<8x8xbf16>
    %c0_25 = arith.constant 0 : index
    %c88 = arith.constant 88 : index
    %59 = vector.load %arg6[%c0_25, %c88] : memref<8x96xbf16, #tpu.memory_space<vmem>>, vector<8x8xbf16>
    %cst_26 = arith.constant dense<0.000000e+00> : vector<8x8xf32>
    %60 = tpu.matmul %57, %58, %cst_26 {dimension_numbers = #tpu.dot_dimension_numbers<[1], [1], [0], [0], [0, 0, 1, 0], [], []>} : vector<8x8xbf16>, vector<8x8xbf16>, vector<8x8xf32> -> vector<8x8xf32>
    %cst_27 = arith.constant dense<0xFF800000> : vector<8xf32>
    %61 = vector.multi_reduction <maximumf>, %60, %cst_27 [1] : vector<8x8xf32> to vector<8xf32>
    %62 = vector.shape_cast %61 : vector<8xf32> to vector<8x1xf32>
    %63 = vector.broadcast %62 : vector<8x1xf32> to vector<8x8xf32>
    %64 = arith.subf %60, %63 : vector<8x8xf32>
    %65 = math.exp %64 : vector<8x8xf32>
    %cst_28 = arith.constant dense<0.000000e+00> : vector<8xf32>
    %66 = vector.multi_reduction <add>, %65, %cst_28 [1] : vector<8x8xf32> to vector<8xf32>
    %67 = vector.shape_cast %66 : vector<8xf32> to vector<8x1xf32>
    %68 = arith.truncf %65 : vector<8x8xf32> to vector<8x8xbf16>
    %cst_29 = arith.constant dense<0.000000e+00> : vector<8x8xf32>
    %69 = tpu.matmul %68, %59, %cst_29 {dimension_numbers = #tpu.dot_dimension_numbers<[1], [0], [0], [1], [0, 0, 1, 1], [], []>} : vector<8x8xbf16>, vector<8x8xbf16>, vector<8x8xf32> -> vector<8x8xf32>
    %70 = vector.broadcast %67 : vector<8x1xf32> to vector<8x8xf32>
    %71 = arith.divf %69, %70 : vector<8x8xf32>
    %c0_30 = arith.constant 0 : index
    %c24_31 = arith.constant 24 : index
    %72 = vector.load %arg7[%c0_30, %c24_31] : memref<8x32xf32, #tpu.memory_space<vmem>>, vector<8x8xf32>
    tpu.vector_store %arg7[%c0_30, %c24_31], %71 {strides = array<i32>} : memref<8x32xf32, #tpu.memory_space<vmem>>, vector<8x8xf32>,
    %c0_32 = arith.constant 0 : index
    %c0_33 = arith.constant 0 : index
    %73 = vector.load %arg7[%c0_32, %c0_33] : memref<8x32xf32, #tpu.memory_space<vmem>>, vector<8x32xf32>
    %74 = arith.truncf %73 : vector<8x32xf32> to vector<8x32xbf16>
    %c0_34 = arith.constant 0 : index
    %c0_35 = arith.constant 0 : index
    %75 = vector.load %arg4[%c0_34, %c0_35] : memref<32x32xbf16, #tpu.memory_space<vmem>>, vector<32x32xbf16>
    %cst_36 = arith.constant dense<0.000000e+00> : vector<8x32xf32>
    %76 = tpu.matmul %74, %75, %cst_36 {dimension_numbers = #tpu.dot_dimension_numbers<[1], [0], [0], [1], [0, 0, 1, 1], [], []>} : vector<8x32xbf16>, vector<32x32xbf16>, vector<8x32xf32> -> vector<8x32xf32>
    %c0_37 = arith.constant 0 : index
    %c0_38 = arith.constant 0 : index
    %c0_39 = arith.constant 0 : index
    %77 = vector.load %arg5[%c0_37, %c0_38, %c0_39] : memref<1x8x32xf32, #tpu.memory_space<vmem>>, vector<1x8x32xf32>
    %78 = vector.shape_cast %77 : vector<1x8x32xf32> to vector<8x32xf32>
    %79 = vector.shape_cast %76 : vector<8x32xf32> to vector<1x8x32xf32>
    tpu.vector_store %arg5[%c0_37, %c0_38, %c0_39], %79 {strides = array<i32>} : memref<1x8x32xf32, #tpu.memory_space<vmem>>, vector<1x8x32xf32>,
    return
  }
  func.func @transform_0(%arg0: i32, %arg1: i32) -> (i32, i32, i32) {
    %c0_i32 = arith.constant 0 : i32
    %c0_i32_0 = arith.constant 0 : i32
    %c0_i32_1 = arith.constant 0 : i32
    return %arg0, %c0_i32, %c0_i32_0 : i32, i32, i32
  }
  func.func @transform_1(%arg0: i32, %arg1: i32) -> (i32, i32) {
    %c0_i32 = arith.constant 0 : i32
    %c0_i32_0 = arith.constant 0 : i32
    %c0_i32_1 = arith.constant 0 : i32
    return %c0_i32, %c0_i32_0 : i32, i32
  }
  func.func @transform_2(%arg0: i32, %arg1: i32) -> (i32, i32) {
    %c0_i32 = arith.constant 0 : i32
    %c0_i32_0 = arith.constant 0 : i32
    %c0_i32_1 = arith.constant 0 : i32
    return %c0_i32, %c0_i32_0 : i32, i32
  }
  func.func @transform_3(%arg0: i32, %arg1: i32) -> (i32, i32, i32) {
    %c0_i32 = arith.constant 0 : i32
    %c0_i32_0 = arith.constant 0 : i32
    return %arg0, %arg1, %c0_i32 : i32, i32, i32
  }
}

</mosaic_0001>

<bundles_post_ra>
// kernel: tpu_custom_call.1
= control target key start
LH: loop header
LB: loop body
LE: loop exit
PB: predicated region body
PF: predicated region fallthrough
CT: control target
= control target key end

     0   :  { %8 = vsyncpa [#allocation5], 0  ;;  %s1760_s0 = inlined_call_operand.hbm [shape: bf16[2,8,32], index: 0, kind: input, shape index: {}]   ;;  %s1761_s1 = inlined_call_operand.hbm [shape: bf16[32,96], index: 1, kind: input, shape index: {}]   ;;  %s1762_s2 = inlined_call_operand.hbm [shape: bf16[32,32], index: 2, kind: input, shape index: {}]   ;;  %s1763_s3 = inlined_call_operand.hbm [shape: f32[2,8,32], index: 3, kind: output, shape index: {}]  }
   0x1   :  { %10 = vsyncpa [#allocation5 + $0x1], 0 }
   0x2   :  { %11 = vsyncpa [#allocation8], 0 }
   0x3   :  { %12 = vsyncpa [#allocation6], 0 }
   0x4   :  { %14 = vsyncpa [#allocation6 + $0x1], 0  ;;  %s1437_s12 = smov 0   ;;  %s1439_s13 = smov 0  }
   0x5   :  { %s1441_s14 = smov 0   ;;  %s1443_s15 = smov 0  }
   0x6   :  { %s1445_s16 = smov 0   ;;  %s1447_s17 = smov 0  }
   0x7 LB: > { %s969_s18 = sadd.s32 4294967295, %s1393_s17   ;;  %s970_s19 = sadd.s32 4294967294, %s1393_s17   ;;  %s1393_s17 = sphi %s1447_s17, %s20_s17   ;;  %s1389_s16 = sphi %s1445_s16, %s1785_s16   ;;  %s1385_s15 = sphi %s1443_s15, %s1784_s15   ;;  %s1381_s14 = sphi %s1441_s14, %s1783_s14   ;;  %s1377_s13 = sphi %s1439_s13, %s1782_s13   ;;  %s1373_s12 = sphi %s1437_s12, %s1781_s12  }
   0x8   : > { %p52_p0 = scmp.ne.s32.totalorder %s1377_s13, %s1373_s12  ;;  %p1471_p1 = scmp.eq.s32.totalorder %s969_s18, 0 }
   0x9   : > { %p1475_p2 = scmp.eq.s32.totalorder %s969_s18, 1  ;;  %p126_p3 = scmp.eq.s32.totalorder %s970_s19, 1 }
   0xa   : > { %s1768_s20 = scalar_select %p1471_p1, 1, 0 }
   0xb   : > { %p1481_p4 = por %p1471_p1, %p52_p0  ;;  %p971_p5 = scmp.ge.s32.totalorder %s1393_s17, 1 }
   0xc   : > { %p1486_p6 = por %p126_p3, %p52_p0  ;;  %p133_p7 = scmp.lt.s32.totalorder %s1393_s17, 3 }
   0xd   : > { %s1770_s22 = scalar_select %p1481_p4, 1, 0 }
   0xe   : > { %s1771_s23 = scalar_select %p1486_p6, 1, 0 }
   0xf   : > { %p1491_p8 = pnand %p971_p5, %p133_p7  ;;  %s1395_s25 = smov [#allocation7]  }
  0x10   : > { %s145_s26 = sshll.u32 %s1395_s25, 4  ;;  %s1396_s28 = smov [#allocation9]   ;;  %s1495_s26 = int_to_ptr.vmem [resolvable:$true] %s145_s26 }
  0x11   : > { %p1105_p9 = pneg %p1491_p8  ;;  %s158_s29 = sshll.u32 %s1396_s28, 4  ;;  %s1506_s29 = int_to_ptr.vmem [resolvable:$true] %s158_s29 }
  0x12   : > { %s1221_s5 = scalar_lea.hbm %s1761_s1, 256 }
  0x13   : > { %p1502_p11 = pnand %p1105_p9, %p1471_p1  ;;  %p1222_p12 = scmp.ne.s32.totalorder %s1761_s1, %s1221_s5 }
  0x14   : > { %p1228_p5 = scmp.lt.u32.totalorder %s1221_s5, %s1761_s1 }
  0x15   : > { %p1223_p13 = pneg %p1502_p11 }
  0x17   : > { %p1224_p0 = pnand %p1223_p13, %p1222_p12 }
  0x19   : > { %p1225_p3 = pneg %p1224_p0 }
  0x1b   : > { %p1230_p7 = pnand %p1228_p5, %p1225_p3 }
  0x1d   : > { %1233 = shalt.err (!%p1230_p7)
}
  0x1e   : > { %s1234_s10 = scalar_lea.vmem %s1495_s26, 256  ;;  %p1242_p1 = scmp.lt.s32.totalorder %s1495_s26, %s1495_s26 }
  0x1f   : > { %p1235_p9 = scmp.ne.s32.totalorder %s1495_s26, %s1234_s10  ;;  %p1243_p12 = scmp.lt.s32.totalorder %s1234_s10, %s1234_s10 }
  0x21   : > { %p1237_p10 = pnand %p1235_p9, %p1223_p13  ;;  %p1244_p0 = por %p1243_p12, %p1242_p1 }
  0x23   : > { %p1238_p6 = pneg %p1237_p10 }
  0x25   : > { %p1245_p4 = pnand %p1244_p0, %p1238_p6 }
  0x27   : > { %1248 = shalt.err (!%p1245_p4)
}
  0x28   : > { %s1397_s11 = smov 64   ;;  %s1398_s18 = smov 4  }
  0x29   : > { %1108 = dma.hbm_to_vmem [thread:$0]  (!%p1502_p11), %s1761_s1, 256, %s1495_s26, [#allocation8], %s1397_s11, %s1397_s11, %s1398_s18  }
  0x2a   : > { %s1249_s4 = scalar_lea.hbm %s1762_s2, 256 }
  0x2b   : > { %p1250_p1 = scmp.ne.s32.totalorder %s1762_s2, %s1249_s4  ;;  %p1256_p10 = scmp.lt.u32.totalorder %s1249_s4, %s1762_s2 }
  0x2d   : > { %p1252_p4 = pnand %p1250_p1, %p1223_p13 }
  0x2f   : > { %p1253_p6 = pneg %p1252_p4 }
  0x31   : > { %p1258_p3 = pnand %p1256_p10, %p1253_p6 }
  0x33   : > { %1261 = shalt.err (!%p1258_p3)
}
  0x34   : > { %s1262_s26 = scalar_lea.vmem %s1506_s29, 256  ;;  %p1270_p12 = scmp.lt.s32.totalorder %s1506_s29, %s1506_s29 }
  0x35   : > { %p1263_p5 = scmp.ne.s32.totalorder %s1506_s29, %s1262_s26  ;;  %p1271_p0 = scmp.lt.s32.totalorder %s1262_s26, %s1262_s26 }
  0x37   : > { %p1265_p7 = pnand %p1263_p5, %p1223_p13  ;;  %p1272_p1 = por %p1271_p0, %p1270_p12 }
  0x39   : > { %p1266_p9 = pneg %p1265_p7 }
  0x3b   : > { %p1273_p4 = pnand %p1272_p1, %p1266_p9 }
  0x3d   : > { %1276 = shalt.err (!%p1273_p4)
}
  0x3e   : > { %1111 = dma.hbm_to_vmem [thread:$0]  (!%p1502_p11), %s1762_s2, 256, %s1506_s29, [#allocation8], %s1397_s11, %s1397_s11, %s1398_s18  }
  0x3f   : > { %s32_s19 = sadd.s32 1, %s1389_s16  ;;  %s39_s25 = sadd.s32 1, %s1381_s14 }
  0x40   : > { %p34_p13 = scmp.ge.s32.totalorder %s32_s19, 2  ;;  %p46_p6 = scmp.ne.s32.totalorder %s1381_s14, %s1377_s13 }
  0x41   : > { %p47_p10 = scmp.eq.s32.totalorder %s1393_s17, 0  ;;  %p1122_p3 = scmp.lt.s32.totalorder %s1393_s17, 2 }
  0x42   : > { %s1787_s19 = smov (%p34_p13, %s32_s19), 0  ;;  %p1570_p7 = por %p1475_p2, %p46_p6 }
  0x43   : > { %p48_p5 = por %p47_p10, %p46_p6  ;;  %s36_s28 = ssub.s32 %s1389_s16, %s1787_s19 }
  0x44   : > { %s1774_s27 = scalar_select %p1570_p7, 1, 0 }
  0x45   : > { %s172_s30 = sand.u32 1, %s1381_s14   ;;  %p37_p9 = scmp.eq.s32.totalorder %s36_s28, 0 }
  0x46   : > { %s975_s29 = sshll.u32 %s172_s30, 2  ;;  %s976_s11 = sshll.u32 %s1389_s16, 6 }
  0x47   : > { %s1579_s18 = scalar_select %p37_p9, %s1381_s14, %s39_s25  }
  0x48   : > { %s1584_s6 = scalar_lea.hbm %s1760_s0, %s976_s11  ;;  %s176_s21 = scalar_lea.vmem [#allocation4], %s975_s29 }
  0x49   : > { %s183_s7 = sshll.u32 %s176_s21, 4  ;;  %p1588_p2 = pnand %p1122_p3, %p48_p5  ;;  %s1592_s7 = int_to_ptr.vmem [resolvable:$true] %s183_s7 }
  0x4a   : > { %s173_s26 = scalar_lea.sflag [#allocation5], %s172_s30  ;;  %s1277_s9 = scalar_lea.hbm %s1584_s6, 64 }
  0x4b   : > { %p1278_p11 = scmp.ne.s32.totalorder %s1584_s6, %s1277_s9  ;;  %p1279_p12 = pneg %p1588_p2 }
  0x4c   : > { %s1282_s28 = scalar_lea.hbm %s1760_s0, 128  ;;  %p1283_p4 = scmp.lt.u32.totalorder %s1584_s6, %s1760_s0 }
  0x4d   : > { %p1280_p0 = pnand %p1279_p12, %p1278_p11  ;;  %p1284_p13 = scmp.lt.u32.totalorder %s1282_s28, %s1277_s9 }
  0x4e   : > { %p1286_p10 = scmp.lt.u32.totalorder %s1277_s9, %s1584_s6 }
  0x4f   : > { %p1281_p1 = pneg %p1280_p0  ;;  %p1285_p6 = por %p1284_p13, %p1283_p4 }
  0x51   : > { %p1287_p3 = por %p1286_p10, %p1285_p6 }
  0x53   : > { %p1288_p5 = pnand %p1287_p3, %p1281_p1 }
  0x55   : > { %1291 = shalt.err (!%p1288_p5)
}
  0x56   : > { %s1292_s30 = scalar_lea.vmem %s1592_s7, 64  ;;  %s1399_s4 = smov [#allocation4]  }
  0x57   : > { %p1293_p9 = scmp.ne.s32.totalorder %s1592_s7, %s1292_s30  ;;  %s1297_s5 = sshll.u32 %s1399_s4, 4  ;;  %s1298_s5 = int_to_ptr.vmem [resolvable:$false] %s1297_s5 }
  0x58   : > { %s1299_s21 = scalar_lea.vmem %s1298_s5, 128  ;;  %p1300_p7 = scmp.lt.s32.totalorder %s1592_s7, %s1298_s5 }
  0x59   : > { %p1295_p11 = pnand %p1293_p9, %p1279_p12  ;;  %p1301_p4 = scmp.lt.s32.totalorder %s1299_s21, %s1292_s30 }
  0x5b   : > { %p1296_p0 = pneg %p1295_p11  ;;  %p1302_p13 = por %p1301_p4, %p1300_p7 }
  0x5d   : > { %p1303_p6 = pnand %p1302_p13, %p1296_p0 }
  0x5f   : > { %1306 = shalt.err (!%p1303_p6)
}
  0x60   : > { %1115 = dma.hbm_to_vmem [thread:$0]  (!%p1588_p2), %s1584_s6, 64, %s1592_s7, %s173_s26  }
  0x61   : > { %192 = sbr.rel (%p1491_p8) target bundleno = 1455 (0x5af), region = 32  ;;  %s1622_s9 = sand.u32 (!%p1491_p8), 1, %s1377_s13  }
  0x62   : > { %s978_s10 = sshll.u32 (!%p1491_p8), %s1622_s9, 2  ;;  %s195_s25 = scalar_lea.sflag (!%p1491_p8), [#allocation5], %s1622_s9 }
  0x63   : > { %s198_s28 = scalar_lea.vmem (!%p1491_p8), [#allocation4], %s978_s10  ;;  %p1776_p7 = scmp.ne.s32.totalorder (!%p1491_p8), %s1770_s22, 0 }
  0x68   : > { %1360 = dma.done.wait (%p1776_p7), %s195_s25, 64  }
  0x69   : > { %1362 = vsyncadd (%p1776_p7), %s195_s25, 4294967232  ;;  %p1777_p12 = scmp.ne.s32.totalorder %s1768_s20, 0 }
  0x6b   : > { %1364 = dma.done.wait (%p1777_p12), [#allocation8], 512  }
  0x6c   : > { %1366 = vsyncadd (%p1777_p12), [#allocation8], 4294966784  ;;  %v1400_v0 = vmov 0.0   ;;  %vm1401_vm0 = vmmov 0   ;;  %v1194_v1 = vld [vmem:[#allocation7] sm:$0xff]   ;;  %v1195_v2 = vld [vmem:[#allocation7 + $0x8] sm:$0xff]  }
  0x6d   : > { %1029 = vmatprep.subr.bf16.mxu0 %v1400_v0  ;;  %1033 = vmatprep.mubr.msk.bf16.mxu0 %vm1401_vm0, %v1400_v0  ;;  %v234_v3 = vld [vmem:[%s198_s28] sm:$0xf]  ;;  %vm251_vm1 = vcmask 261120   ;;  %vm296_vm2 = vcmask 781312   ;;  %s1402_s20 = smov 120   ;;  %s1403_s22 = smov 96  }
  0x6e   : > { %1037 = vmatprep.subr.bf16.mxu1 %v1400_v0  ;;  %1039 = vmatprep.mubr.msk.bf16.mxu1 %vm1401_vm0, %v1400_v0  ;;  %s1404_s24 = smov 80   ;;  %s1405_s6 = smov 88   ;;  %vm310_vm3 = vcmask 64512   ;;  %vm372_vm4 = vcmask 1043456   ;;  %vm541_vm5 = vcmask 130112   ;;  %vm665_vm6 = vcmask 195712  }
  0x6f   : > { %1030 = vmatpush3.bf16.msra.mxu0 %v1194_v1  ;;  %s1406_s7 = smov 72   ;;  %s1407_s8 = smov 112   ;;  %vm789_vm7 = vcmask 261312  }
  0x70   : > { %1031 = vmatprep.subr.bf16.mxu0 %v1400_v0  ;;  %s1408_s26 = smov 104   ;;  %s1409_s29 = smov 56  }
  0x71   : > { %s1410_s11 = smov 64   ;;  %s1411_s30 = smov 40  }
  0x72   : > { %s1412_s4 = smov 48   ;;  %s1413_s5 = smov 8  }
  0x73   : > { %1032 = vmatpush3.bf16.msra.mxu0 %v1195_v2  ;;  %s1414_s21 = smov 16   ;;  %s1415_s10 = smov 24  }
  0x74   : > { %1043 = vmatprep.subr.bf16.mxu0 %v1400_v0  ;;  %s981_s25 = sshll.u32 %s1622_s9, 3  ;;  %s1004_s28 = sshll.u32 %s1385_s15, 7 }
  0x75   : > { %p1778_p2 = scmp.ne.s32.totalorder %s1774_s27, 0  ;;  %s1416_s15 = smov [#allocation10]  }
  0x76   : > { %1034 = vmatmul.mubr.msk.bf16.vlgmr.msra.gmra.mrb[0].mxu0 %vm251_vm1, %v234_v3 }
  0x77   : > { %1045 = vmatprep.mubr.msk.bf16.mxu0 %vm1401_vm0, %v1400_v0 }
 0x149   : > { %v289_v4 = vpop.f32.mrb[0].mxu0 }
 0x14a   : > { %v295_v5 = vpack.c.bf16 %v289_v4, %v289_v4  ;;  %v1035_v6 = vpop.f32.mrb[1].mxu0 }
 0x14b   : > { %v292_v7 = vpop.f32.mrb[2].mxu0 }
 0x14c   : > { %297 = vst.msk [vmem:[#allocation2] sm:$0xf] %vm296_vm2, %v295_v5  ;;  %v1036_v8 = vpop.f32.mrb[3].mxu0 }
 0x153   : > { %v1196_v9 = vld [vmem:[#allocation2] ss:$0 sps:$4 sm:$0xff]  }
 0x154   : > { %v1645_v10 = vld [vmem:[#allocation2] ss:$0 sps:$4 sm:$0xff]   ;;  %424 = vrot.lane.b32.xlu1 %v1196_v9, %s1402_s20  ;;  %s228_s20 = scalar_lea.vmem [#allocation10], %s981_s25 }
 0x155   : > { %308 = vrot.lane.b32.xlu0 %v1645_v10, %s1403_s22  ;;  %v1648_v11 = vld [vmem:[#allocation2] ss:$0 sps:$4 sm:$0xff]   ;;  %s869_s22 = sshll.u32 %s228_s20, 4  ;;  %s1712_s22 = int_to_ptr.vmem [resolvable:$true] %s869_s22 }
 0x156   : > { %v1199_v12 = vld [vmem:[#allocation2] ss:$0 sps:$4 sm:$0xff]  }
 0x157   : > { %v1651_v13 = vld [vmem:[#allocation2] ss:$0 sps:$4 sm:$0xff]  }
 0x158   : > { %553 = vrot.lane.b32.xlu1 %v1648_v11, %s1404_s24  ;;  %v1201_v14 = vld [vmem:[#allocation2] ss:$0 sps:$4 sm:$0xff]  }
 0x159   : > { %429 = vrot.lane.b32.xlu0 %v1199_v12, %s1405_s6  ;;  %v1202_v15 = vld [vmem:[#allocation2] ss:$0 sps:$4 sm:$0xff]  }
 0x15a   : > { %v303_v20 = vld [vmem:[#allocation2] sm:$0xf] }
 0x15c   : > { %677 = vrot.lane.b32.xlu1 %v1651_v13, %s1406_s7  ;;  %s1710_s7 = scalar_lea.hbm %s1763_s3, %s1004_s28 }
 0x15d   : > { %548 = vrot.lane.b32.xlu0 %v1201_v14, %s1407_s8  ;;  %s855_s8 = scalar_lea.sflag [#allocation6], %s1622_s9 }
 0x161   : > { %672 = vrot.lane.b32.xlu0 %v1202_v15, %s1408_s26  ;;  %s1307_s26 = scalar_lea.vmem %s1712_s22, 128 }
 0x162   : > { %p1308_p8 = scmp.ne.s32.totalorder %s1712_s22, %s1307_s26 }
 0x164   : > { %p1309_p1 = pnand %p1308_p8, %p1778_p2 }
 0x166   : > { %p1310_p10 = pneg %p1309_p1 }
 0x1c6   : > { %v425_v19 = vpop.permute.xlu1 %424 }
 0x1c7   : > { %v309_v16 = vpop.permute.xlu0 %308 }
 0x1c8   : > { %v315_v17 = vsel %vm310_vm3, %v309_v16, 0 }
 0x1c9   : > { %1038 = vmatpush3.bf16.xpose.msra.mxu1 %v315_v17 }
 0x1ca   : > { %1049 = vmatprep.subr.bf16.mxu1 %v1400_v0  ;;  %v554_v22 = vpop.permute.xlu1 %553 }
 0x1cb   : > { %v430_v18 = vpop.permute.xlu0 %429  ;;  %v559_v23 = vsel %vm310_vm3, %v554_v22, 0 }
 0x1cc   : > { %v435_v21 = vsel %vm310_vm3, %v430_v18, 0 }
 0x1ce   : > { %v678_v24 = vpop.permute.xlu1 %677 }
 0x1cf   : > { %v549_v25 = vpop.permute.xlu0 %548  ;;  %v683_v26 = vsel %vm310_vm3, %v678_v24, 0 }
 0x1d0   : > { %1040 = vmatmul.mubr.msk.bf16.vlgmr.msra.gmra.mrb[0].mxu1 %vm310_vm3, %v303_v20 }
 0x1d1   : > { %1050 = vmatpush3.bf16.xpose.msra.mxu1 %v435_v21  ;;  %1051 = vmatprep.mubr.msk.bf16.mxu1 %vm1401_vm0, %v1400_v0 }
 0x1d2   : > { %1061 = vmatprep.subr.bf16.mxu1 %v1400_v0 }
 0x1d3   : > { %v673_v27 = vpop.permute.xlu0 %672 }
 0x1d8   : > { %1052 = vmatmul.mubr.msk.bf16.vlgmr.msra.gmra.mrb[4].mxu1 %vm310_vm3, %v425_v19 }
 0x1d9   : > { %1062 = vmatpush3.bf16.xpose.msra.mxu1 %v559_v23  ;;  %1063 = vmatprep.mubr.msk.bf16.mxu1 %vm1401_vm0, %v1400_v0 }
 0x1da   : > { %1073 = vmatprep.subr.bf16.mxu1 %v1400_v0 }
 0x1e0   : > { %1064 = vmatmul.mubr.msk.bf16.vlgmr.msra.gmra.mrb[8].mxu1 %vm310_vm3, %v549_v25 }
 0x1e1   : > { %1074 = vmatpush3.bf16.xpose.msra.mxu1 %v683_v26  ;;  %1075 = vmatprep.mubr.msk.bf16.mxu1 %vm1401_vm0, %v1400_v0 }
 0x1e2   : > { %1085 = vmatprep.subr.bf16.mxu1 %v1400_v0 }
 0x1e8   : > { %1076 = vmatmul.mubr.msk.bf16.vlgmr.msra.gmra.mrb[12].mxu1 %vm310_vm3, %v673_v27 }
 0x1e9   : > { %1089 = vmatprep.mubr.msk.bf16.mxu1 %vm1401_vm0, %v1400_v0 }
 0x2a3   : > { %v351_v28 = vpop.f32.mrb[0].mxu1 }
 0x2a4   : > { %v1041_v29 = vpop.f32.mrb[1].mxu1  ;;  %v357_v30 = vsel %vm310_vm3, %v351_v28, -inf }
 0x2a5   : > { %358 = vmax.xlane.f32.xlu1 %v357_v30  ;;  %v354_v31 = vpop.f32.mrb[2].mxu1 }
 0x2a6   : > { %v1042_v32 = vpop.f32.mrb[3].mxu1 }
 0x2ab   : > { %v471_v33 = vpop.f32.mrb[4].mxu1 }
 0x2ac   : > { %v1053_v34 = vpop.f32.mrb[5].mxu1  ;;  %v477_v35 = vsel %vm310_vm3, %v471_v33, -inf }
 0x2ad   : > { %478 = vmax.xlane.f32.xlu0 %v477_v35  ;;  %v474_v36 = vpop.f32.mrb[6].mxu1 }
 0x2ae   : > { %v1054_v37 = vpop.f32.mrb[7].mxu1 }
 0x2b3   : > { %v595_v38 = vpop.f32.mrb[8].mxu1 }
 0x2b4   : > { %v1065_v39 = vpop.f32.mrb[9].mxu1  ;;  %v601_v40 = vsel %vm310_vm3, %v595_v38, -inf }
 0x2b5   : > { %602 = vmax.xlane.f32.xlu0 %v601_v40  ;;  %v598_v41 = vpop.f32.mrb[10].mxu1 }
 0x2b6   : > { %487 = vrot.lane.b32.xlu1 %v1199_v12, %s1409_s29  ;;  %v1066_v42 = vpop.f32.mrb[11].mxu1  ;;  %s1311_s29 = sshll.u32 %s1416_s15, 4  ;;  %s1312_s29 = int_to_ptr.vmem [resolvable:$false] %s1311_s29 }
 0x2b7   : > { %p1314_p3 = scmp.lt.s32.totalorder %s1712_s22, %s1312_s29 }
 0x2bb   : > { %v719_v43 = vpop.f32.mrb[12].mxu1 }
 0x2bc   : > { %v1077_v44 = vpop.f32.mrb[13].mxu1  ;;  %v725_v47 = vsel %vm310_vm3, %v719_v43, -inf }
 0x2bd   : > { %v722_v45 = vpop.f32.mrb[14].mxu1 }
 0x2be   : > { %v1078_v46 = vpop.f32.mrb[15].mxu1 }
 0x2cb   : > { %367 = vrot.lane.b32.xlu0 %v1645_v10, %s1410_s11  ;;  %s1313_s11 = scalar_lea.vmem %s1312_s29, 256 }
 0x2cc   : > { %p1315_p5 = scmp.lt.s32.totalorder %s1313_s11, %s1307_s26 }
 0x2ce   : > { %p1316_p9 = por %p1315_p5, %p1314_p3 }
 0x2cf   : > { %735 = vrot.lane.b32.xlu0 %v1651_v13, %s1411_s30 }
 0x2d0   : > { %p1317_p11 = pnand %p1316_p9, %p1310_p10 }
 0x2da   : > { %726 = vmax.xlane.f32.xlu1 %v725_v47 }
 0x2eb   : > { %611 = vrot.lane.b32.xlu1 %v1648_v11, %s1412_s4 }
 0x332   : > { %v359_v48 = vpop.xlane.xlu1 %358 }
 0x333   : > { %v360_v49 = vsub.f32 %v351_v28, %v359_v48 }
 0x335   : > { %v361_v50 = vmul.f32 1.442695, %v360_v49 }
 0x336   : > { %v488_v60 = vpop.permute.xlu1 %487 }
 0x337   : > { %1205 = vpow2.f32 %v361_v50  ;;  %v493_v1 = vsel %vm372_vm4, %v488_v60, 0 }
 0x33a   : > { %v479_v51 = vpop.xlane.xlu0 %478 }
 0x33b   : > { %v480_v52 = vsub.f32 %v471_v33, %v479_v51  ;;  %v1203_v33 = vld [vmem:[#allocation9] sm:$0xff]  }
 0x33c   : > { %1086 = vmatpush3.bf16.msra.mxu1 %v1203_v33 }
 0x33d   : > { %v481_v53 = vmul.f32 1.442695, %v480_v52  ;;  %1087 = vmatprep.subr.bf16.mxu1 %v1400_v0 }
 0x33f   : > { %1207 = vpow2.f32 %v481_v53 }
 0x341   : > { %v1206_v57 = vpop.eup %1205 }
 0x342   : > { %v603_v54 = vpop.xlane.xlu0 %602  ;;  %v366_v62 = vpack.c.bf16 %v1206_v57, %v1206_v57  ;;  %v363_v2 = vsel %vm310_vm3, %v1206_v57, 0.0 }
 0x343   : > { %v604_v55 = vsub.f32 %v595_v38, %v603_v54  ;;  %v1204_v38 = vld [vmem:[#allocation9 + $0x8] sm:$0xff]  }
 0x344   : > { %1088 = vmatpush3.bf16.msra.mxu1 %v1204_v38 }
 0x345   : > { %v605_v56 = vmul.f32 1.442695, %v604_v55 }
 0x346   : > { %v368_v58 = vpop.permute.xlu0 %367 }
 0x347   : > { %1209 = vpow2.f32 %v605_v56  ;;  %v374_v59 = vsel %vm372_vm4, %v368_v58, 0 }
 0x348   : > { %1044 = vmatpush3.bf16.msra.mxu0 %v374_v59 }
 0x349   : > { %v1208_v61 = vpop.eup %1207  ;;  %1055 = vmatprep.subr.bf16.mxu0 %v1400_v0 }
 0x34a   : > { %v483_v63 = vsel %vm310_vm3, %v1208_v61, 0.0  ;;  %v486_v4 = vpack.c.bf16 %v1208_v61, %v1208_v61  ;;  %v736_v11 = vpop.permute.xlu0 %735 }
 0x34b   : > { %1046 = vmatmul.mubr.msk.bf16.vlgmr.msra.gmra.mrb[4].mxu0 %vm310_vm3, %v366_v62  ;;  %484 = vadd.xlane.f32.xlu1 %v483_v63  ;;  %v741_v13 = vsel %vm372_vm4, %v736_v11, 0 }
 0x34c   : > { %1056 = vmatpush3.bf16.msra.mxu0 %v493_v1  ;;  %1057 = vmatprep.mubr.msk.bf16.mxu0 %vm1401_vm0, %v1400_v0 }
 0x34d   : > { %1067 = vmatprep.subr.bf16.mxu0 %v1400_v0 }
 0x34f   : > { %364 = vadd.xlane.f32.xlu1 %v363_v2 }
 0x351   : > { %v1210_v3 = vpop.eup %1209 }
 0x352   : > { %v607_v5 = vsel %vm310_vm3, %v1210_v3, 0.0  ;;  %v610_v12 = vpack.c.bf16 %v1210_v3, %v1210_v3 }
 0x353   : > { %608 = vadd.xlane.f32.xlu0 %v607_v5  ;;  %1058 = vmatmul.mubr.msk.bf16.vlgmr.msra.gmra.mrb[8].mxu0 %vm310_vm3, %v486_v4 }
 0x354   : > { %1069 = vmatprep.mubr.msk.bf16.mxu0 %vm1401_vm0, %v1400_v0 }
 0x367   : > { %v727_v6 = vpop.xlane.xlu1 %726 }
 0x368   : > { %v728_v7 = vsub.f32 %v719_v43, %v727_v6 }
 0x36a   : > { %v729_v8 = vmul.f32 1.442695, %v728_v7 }
 0x36b   : > { %v612_v9 = vpop.permute.xlu1 %611 }
 0x36c   : > { %1211 = vpow2.f32 %v729_v8  ;;  %v617_v10 = vsel %vm372_vm4, %v612_v9, 0 }
 0x36d   : > { %1068 = vmatpush3.bf16.msra.mxu0 %v617_v10 }
 0x36e   : > { %1079 = vmatprep.subr.bf16.mxu0 %v1400_v0 }
 0x370   : > { %1070 = vmatmul.mubr.msk.bf16.vlgmr.msra.gmra.mrb[12].mxu0 %vm310_vm3, %v610_v12 }
 0x371   : > { %1080 = vmatpush3.bf16.msra.mxu0 %v741_v13  ;;  %1081 = vmatprep.mubr.msk.bf16.mxu0 %vm1401_vm0, %v1400_v0 }
 0x376   : > { %v1212_v14 = vpop.eup %1211 }
 0x377   : > { %v731_v15 = vsel %vm310_vm3, %v1212_v14, 0.0  ;;  %v734_v16 = vpack.c.bf16 %v1212_v14, %v1212_v14 }
 0x378   : > { %732 = vadd.xlane.f32.xlu0 %v731_v15 }
 0x379   : > { %1082 = vmatmul.mubr.msk.bf16.vlgmr.msra.gmra.mrb[16].mxu0 %vm310_vm3, %v734_v16 }
 0x3d8   : > { %v485_v17 = vpop.xlane.xlu1 %484 }
 0x3dc   : > { %v365_v18 = vpop.xlane.xlu1 %364 }
 0x3dd   : > { %1213 = vrcp.f32 %v365_v18 }
 0x3de   : > { %1215 = vrcp.f32 %v485_v17 }
 0x3e0   : > { %v609_v31 = vpop.xlane.xlu0 %608 }
 0x3e1   : > { %1217 = vrcp.f32 %v609_v31 }
 0x3e7   : > { %v1214_v19 = vpop.eup %1213 }
 0x3e8   : > { %v1216_v25 = vpop.eup %1215 }
 0x3eb   : > { %v1218_v34 = vpop.eup %1217 }
 0x405   : > { %v733_v32 = vpop.xlane.xlu0 %732 }
 0x406   : > { %1219 = vrcp.f32 %v733_v32 }
 0x410   : > { %v1220_v41 = vpop.eup %1219 }
 0x41e   : > { %v410_v20 = vpop.f32.mrb[4].mxu0 }
 0x41f   : > { %v417_v21 = vmul.f32 %v1214_v19, %v410_v20  ;;  %v1047_v22 = vpop.f32.mrb[5].mxu0 }
 0x420   : > { %v413_v23 = vpop.f32.mrb[6].mxu0 }
 0x421   : > { %418 = vst.msk [vmem:[#allocation3] sm:$0xff] %vm310_vm3, %v417_v21  ;;  %v1048_v24 = vpop.f32.mrb[7].mxu0 }
 0x426   : > { %v529_v26 = vpop.f32.mrb[8].mxu0 }
 0x427   : > { %v536_v27 = vmul.f32 %v1216_v25, %v529_v26  ;;  %v1059_v28 = vpop.f32.mrb[9].mxu0 }
 0x428   : > { %v532_v29 = vpop.f32.mrb[10].mxu0 }
 0x429   : > { %538 = vrot.lane.b32.xlu0 %v536_v27, %s1413_s5  ;;  %v1060_v30 = vpop.f32.mrb[11].mxu0 }
 0x443   : > { %v653_v35 = vpop.f32.mrb[12].mxu0 }
 0x444   : > { %v660_v36 = vmul.f32 %v1218_v34, %v653_v35  ;;  %v1071_v37 = vpop.f32.mrb[13].mxu0 }
 0x445   : > { %v656_v39 = vpop.f32.mrb[14].mxu0 }
 0x446   : > { %662 = vrot.lane.b32.xlu1 %v660_v36, %s1414_s21  ;;  %v1072_v40 = vpop.f32.mrb[15].mxu0 }
 0x44c   : > { %v777_v42 = vpop.f32.mrb[16].mxu0 }
 0x44d   : > { %v784_v43 = vmul.f32 %v1220_v41, %v777_v42  ;;  %v1083_v44 = vpop.f32.mrb[17].mxu0 }
 0x44e   : > { %v780_v45 = vpop.f32.mrb[18].mxu0 }
 0x44f   : > { %786 = vrot.lane.b32.xlu1 %v784_v43, %s1415_s10  ;;  %v1084_v46 = vpop.f32.mrb[19].mxu0 }
 0x49b   : > { %v539_v47 = vpop.permute.xlu0 %538 }
 0x49c   : > { %542 = vst.msk [vmem:[#allocation3] sm:$0xff] %vm541_vm5, %v539_v47 }
 0x4b8   : > { %v663_v48 = vpop.permute.xlu1 %662 }
 0x4b9   : > { %666 = vst.msk [vmem:[#allocation3] sm:$0xff] %vm665_vm6, %v663_v48 }
 0x4c1   : > { %v787_v0 = vpop.permute.xlu1 %786 }
 0x4c2   : > { %790 = vst.msk [vmem:[#allocation3] sm:$0xff] %vm789_vm7, %v787_v0 }
 0x4c9   : > { %v791_v49 = vld [vmem:[#allocation3] sm:$0xff] }
 0x4ca   : > { %v792_v50 = vpack.c.bf16 %v791_v49, %v791_v49 }
 0x4cc   : > { %1090 = vmatmul.mubr.msk.bf16.vlgmr.msra.gmra.mrb[16].mxu1 %vm251_vm1, %v792_v50 }
 0x59f   : > { %v847_v51 = vpop.f32.mrb[16].mxu1 }
 0x5a0   : > { %853 = vst.msk [vmem:[%s228_s20] sm:$0xff] %vm251_vm1, %v847_v51  ;;  %v1091_v52 = vpop.f32.mrb[17].mxu1 }
 0x5a1   : > { %v850_v53 = vpop.f32.mrb[18].mxu1 }
 0x5a2   : > { %1320 = shalt.err (!%p1317_p11)
}
 0x5a3   : > { %s1321_s9 = scalar_lea.hbm %s1710_s7, 128  ;;  %s1325_s5 = scalar_lea.hbm %s1763_s3, 256 }
 0x5a4   : > { %p1322_p0 = scmp.ne.s32.totalorder %s1710_s7, %s1321_s9  ;;  %p1326_p6 = scmp.lt.u32.totalorder %s1710_s7, %s1763_s3 }
 0x5a5   : > { %p1327_p7 = scmp.lt.u32.totalorder %s1325_s5, %s1321_s9  ;;  %p1329_p8 = scmp.lt.u32.totalorder %s1321_s9, %s1710_s7 }
 0x5a6   : > { %p1323_p4 = pnand %p1322_p0, %p1778_p2 }
 0x5a7   : > { %p1328_p12 = por %p1327_p7, %p1326_p6 }
 0x5a8   : > { %p1324_p13 = pneg %p1323_p4 }
 0x5a9   : > { %p1330_p1 = por %p1329_p8, %p1328_p12 }
 0x5ab   : > { %p1331_p10 = pnand %p1330_p1, %p1324_p13 }
 0x5ad   : > { %1334 = shalt.err (!%p1331_p10)
}
 0x5ae   : > { %1103 = dma.vmem_to_hbm [thread:$0]  (%p1778_p2), %s1712_s22, 128, %s1710_s7, %s855_s8   ;;  %v1092_v54 = vpop.f32.mrb[19].mxu1 }
 0x5af PF: > { %s881_s25 = sand.u32 1, %s1373_s12   ;;  %p1779_p3 = scmp.ne.s32.totalorder %s1771_s23, 0 }
 0x5b0   : > { %p1780_p5 = scmp.ge.s32.totalorder %s1393_s17, 2  ;;  %s882_s28 = scalar_lea.sflag [#allocation6], %s881_s25 }
 0x5b2   : > { %p1117_p9 = pnand %p1780_p5, %p1779_p3 }
 0x5b4   : > { %1368 = dma.done.wait (!%p1117_p9), %s882_s28, 128  }
 0x5b5   : > { %1370 = vsyncadd (!%p1117_p9), %s882_s28, 4294967168  ;;  %s20_s17 = sadd.s32 1, %s1393_s17   ;;  %s1781_s12 = smov %s1377_s13 }
 0x5b6   : > { %p17_p11 = scmp.ge.s32.totalorder %s20_s17, 4   ;;  %s1782_s13 = smov %s1381_s14 }
 0x5b7   : > { %s1783_s14 = smov %s1579_s18  ;;  %s1784_s15 = smov %s1389_s16 }
 0x5b8   : > { %s1785_s16 = smov %s1787_s19  ;;  %19 = sbr.rel (!%p17_p11) target bundleno = 7 (0x7), region = 90 }
 0x5bf   :  { %887 = vsyncpa [#allocation5], 1 }
 0x5c0   :  { %889 = vsyncpa [#allocation5 + $0x1], 1 }
 0x5c1   :  { %890 = vsyncpa [#allocation8], 1 }
 0x5c2   :  { %891 = vsyncpa [#allocation6], 1 }
 0x5c3   :  { %893 = vsyncpa [#allocation6 + $0x1], 1 }

</bundles_post_ra>
